<compile_context>
chip_gen: v6e
topology: v6e:2x2x1
jax: 0.10.0
libtpu: 0.0.40
codegen_flags: <defaults>
</compile_context>

<pallas_src>
import jax
import jax.numpy as jnp
from jax.experimental import pallas as pl
from jax.experimental.pallas import tpu as pltpu


def _round_up(v, m):
    return ((v + m - 1) // m) * m


def _pick_tile(n_p, desired):
    """Largest multiple of 128 that is <= desired and divides n_p."""
    t = min(desired, n_p)
    t = (t // 128) * 128
    while t > 128 and n_p % t != 0:
        t -= 128
    return max(t, 128)


def gnn_layer_kernel(adj_ref, xw_ref, b_ref, o_ref):
    """One (dst-row tile i, src/reduction tile k) grid step.

    adj_ref: (TM, TK)      bf16 dense adjacency block A[dst, src]
    xw_ref:  (TK, F_p)     bf16 pre-projected features (x @ W^T), padded to 128
    b_ref:   (1, F_p)      f32 bias, K-invariant (DMA'd once)
    o_ref:   (TM, F_p)     f32 output block; doubles as the f32 accumulator
                           (resident in VMEM across the K axis).
    """
    k = pl.program_id(1)

    @pl.when(k == 0)
    def _init():
        o_ref[...] = jnp.zeros_like(o_ref)

    # Propagation partial sum on the MXU: bf16 inputs, f32 accumulation,
    # accumulated straight into the resident output block.
    o_ref[...] += jnp.dot(adj_ref[...], xw_ref[...],
                          preferred_element_type=jnp.float32)

    @pl.when(k == pl.num_programs(1) - 1)
    def _epilogue():
        o_ref[...] += b_ref[...]


def gnn_layer_pallas(adj_bf16, xw_bf16, b, *, tm, tk):
    """adj_bf16: (N_p, N_p) bf16, xw_bf16: (N_p, F_p) bf16, b: (1, F_p) f32
    -> (N_p, F_p) f32."""
    n_p = adj_bf16.shape[0]
    f_p = xw_bf16.shape[1]
    grid = (n_p // tm, n_p // tk)

    cost = pl.CostEstimate(
        flops=2 * n_p * n_p * f_p,
        transcendentals=0,
        bytes_accessed=(n_p * n_p * 2                 # bf16 adjacency stream
                        + grid[0] * n_p * f_p * 2     # xw re-read per row tile
                        + n_p * f_p * 4               # f32 output
                        + f_p * 4),                   # bias (once)
    )

    # Actual double-buffered working set: adjacency + xw inputs (x2 buffers),
    # resident output (x2 for writeback), bias.
    vmem_bytes = (2 * (tm * tk * 2)
                  + 2 * (tk * f_p * 2)
                  + 2 * (tm * f_p * 4)
                  + f_p * 4)
    # Headroom for compiler scratch; cap under v7x's 64 MiB physical per-TC VMEM.
    vmem_limit = min(max(vmem_bytes + 8 * 1024 * 1024, 32 * 1024 * 1024),
                     48 * 1024 * 1024)

    return pl.pallas_call(
        gnn_layer_kernel,
        out_shape=jax.ShapeDtypeStruct((n_p, f_p), jnp.float32),
        grid_spec=pltpu.PrefetchScalarGridSpec(
            num_scalar_prefetch=0,
            grid=grid,
            in_specs=[
                pl.BlockSpec((tm, tk), lambda i, k: (i, k)),     # adjacency
                pl.BlockSpec((tk, f_p), lambda i, k: (k, 0)),    # x @ W^T
                pl.BlockSpec((1, f_p), lambda i, k: (0, 0)),     # bias (hoisted)
            ],
            out_specs=pl.BlockSpec((tm, f_p), lambda i, k: (i, 0)),
        ),
        compiler_params=pltpu.CompilerParams(
            # Row tiles are independent -> megacore-shard them on v7x;
            # K is the reduction axis (output resident) -> arbitrary, last.
            dimension_semantics=("parallel", "arbitrary"),
            vmem_limit_bytes=vmem_limit,
        ),
        cost_estimate=cost,
    )(adj_bf16, xw_bf16, b)


def build_dense_adj(edge_index, edge_weight, n, dtype):
    """Glue (plain JAX): scatter edge weights directly into a dense (n, n)
    adjacency of the kernel dtype, A[dst, src] = w (duplicate edges sum)."""
    src = edge_index[0]
    dst = edge_index[1]
    if edge_weight is None:
        edge_weight = jnp.ones(src.shape, dtype=dtype)
    adj = jnp.zeros((n, n), dtype=dtype)
    adj = adj.at[dst, src].add(edge_weight.astype(dtype))
    return adj


def gnn_layer_forward(x, edge_index, edge_weight, weight_pt, bias, *,
                      tm=2048, tk=1024):
    """x: (N, F_in) f32; edge_index: (2, E); edge_weight: (E,) or None;
    weight_pt: (F_out, F_in) PyTorch Linear weight; bias: (F_out,)."""
    N, F_in = x.shape
    F_out = weight_pt.shape[0]

    # Pad only to the 128-lane boundary (not to a tile multiple), then pick
    # tiles that divide n_p.
    f_p = _round_up(F_out, 128)
    n_p = _round_up(N, 128)
    tm = _pick_tile(n_p, tm)
    tk = _pick_tile(n_p, tk)
    # v7x has 2 TensorCores: keep at least 2 row tiles when possible.
    if n_p // tm < 2 and tm % 256 == 0:
        tm //= 2

    # Dense adjacency built straight in bf16 at the padded size.
    adj = build_dense_adj(edge_index, edge_weight, n_p, jnp.bfloat16)

    # Pre-project the Linear once in XLA (f32 matmul, cast to bf16 for the
    # MXU stream); bias stays in the kernel epilogue.
    xw = jnp.dot(x, weight_pt.T.astype(x.dtype))
    xw_p = jnp.zeros((n_p, f_p), jnp.bfloat16)
    xw_p = xw_p.at[:N, :F_out].set(xw.astype(jnp.bfloat16))

    b_p = jnp.zeros((1, f_p), jnp.float32)
    b_p = b_p.at[0, :F_out].set(bias.astype(jnp.float32))

    out_p = gnn_layer_pallas(adj, xw_p, b_p, tm=tm, tk=tk)
    return out_p[:N, :F_out]


if __name__ == "__main__":
    key = jax.random.PRNGKey(0)
    k_x, k_e, k_w, k_wt, k_b = jax.random.split(key, 5)

    # Small shapes consistent with the module's forward:
    num_nodes = 16
    in_features = 8
    out_features = 32
    num_edges = 40

    # Node features (N, F_in)
    x = jax.random.normal(k_x, (num_nodes, in_features), dtype=jnp.float32)

    # edge_index (2, E) with src row 0, dst row 1; edge weights (E,)
    edge_index = jax.random.randint(k_e, (2, num_edges), 0, num_nodes)
    edge_weight = jax.random.uniform(k_w, (num_edges,), dtype=jnp.float32)

    # PyTorch Linear stores weight as (out, in).
    bound = 1.0 / (in_features ** 0.5)
    weight_pt = jax.random.uniform(
        k_wt, (out_features, in_features), minval=-bound, maxval=bound,
        dtype=jnp.float32)
    bias = jax.random.uniform(
        k_b, (out_features,), minval=-bound, maxval=bound, dtype=jnp.float32)

    out = gnn_layer_forward(x, edge_index, edge_weight, weight_pt, bias)
    out = jax.block_until_ready(out)

    # Plain-JAX reference with the same bf16 propagation / f32 accumulation.
    adj_r = build_dense_adj(edge_index, edge_weight, num_nodes, jnp.bfloat16)
    xw_r = jnp.dot(x, weight_pt.T).astype(jnp.bfloat16)
    ref = jnp.dot(adj_r, xw_r, preferred_element_type=jnp.float32) + bias[None, :]

    assert out.shape == (num_nodes, out_features)
    max_err = float(jnp.max(jnp.abs(out - ref)))
    assert jnp.allclose(out, ref, atol=1e-2, rtol=1e-2), max_err

    print("KERNEL_OK")
</pallas_src>

<mosaic_0001>
module attributes {stable_mosaic.version = 11 : i64} {
  func.func @gnn_layer_kernel(%arg0: i32, %arg1: i32, %arg2: memref<128x128xbf16, #tpu.memory_space<vmem>>, %arg3: memref<128x128xbf16, #tpu.memory_space<vmem>>, %arg4: memref<1x128xf32, #tpu.memory_space<vmem>>, %arg5: memref<128x128xf32, #tpu.memory_space<vmem>>) attributes {dimension_semantics = [#tpu.dimension_semantics<parallel>, #tpu.dimension_semantics<arbitrary>], iteration_bounds = array<i64: 1, 1>, scalar_prefetch = 0 : i64, scratch_operands = 0 : i64, tpu.core_type = #tpu.core_type<tc>, window_params = [{transform_indices = @transform_0, window_bounds = array<i64: 128, 128>}, {transform_indices = @transform_1, window_bounds = array<i64: 128, 128>}, {pipeline_mode = #tpu.pipeline_mode<synchronous>, transform_indices = @transform_2, window_bounds = array<i64: 1, 128>}, {transform_indices = @transform_3, window_bounds = array<i64: 128, 128>}]} {
    %c0_i32 = arith.constant 0 : i32
    %0 = arith.cmpi eq, %arg1, %c0_i32 : i32
    %1 = arith.extui %0 : i1 to i32
    %c0_i32_0 = arith.constant 0 : i32
    %2 = arith.cmpi ne, %1, %c0_i32_0 : i32
    scf.if %2 {
      %cst_10 = arith.constant 0.000000e+00 : f32
      %12 = vector.broadcast %cst_10 : f32 to vector<128x128xf32>
      %c0_11 = arith.constant 0 : index
      %c0_12 = arith.constant 0 : index
      %13 = vector.load %arg5[%c0_11, %c0_12] : memref<128x128xf32, #tpu.memory_space<vmem>>, vector<128x128xf32>
      tpu.vector_store %arg5[%c0_11, %c0_12], %12 {strides = array<i32>} : memref<128x128xf32, #tpu.memory_space<vmem>>, vector<128x128xf32>,
    } else {
    }
    %c0 = arith.constant 0 : index
    %c0_1 = arith.constant 0 : index
    %3 = vector.load %arg5[%c0, %c0_1] : memref<128x128xf32, #tpu.memory_space<vmem>>, vector<128x128xf32>
    %c0_2 = arith.constant 0 : index
    %c0_3 = arith.constant 0 : index
    %4 = vector.load %arg2[%c0_2, %c0_3] : memref<128x128xbf16, #tpu.memory_space<vmem>>, vector<128x128xbf16>
    %c0_4 = arith.constant 0 : index
    %c0_5 = arith.constant 0 : index
    %5 = vector.load %arg3[%c0_4, %c0_5] : memref<128x128xbf16, #tpu.memory_space<vmem>>, vector<128x128xbf16>
    %cst = arith.constant dense<0.000000e+00> : vector<128x128xf32>
    %6 = tpu.matmul %4, %5, %cst {dimension_numbers = #tpu.dot_dimension_numbers<[1], [0], [0], [1], [0, 0, 1, 1], [], []>} : vector<128x128xbf16>, vector<128x128xbf16>, vector<128x128xf32> -> vector<128x128xf32>
    %7 = arith.addf %3, %6 : vector<128x128xf32>
    %c0_6 = arith.constant 0 : index
    %c0_7 = arith.constant 0 : index
    %8 = vector.load %arg5[%c0_6, %c0_7] : memref<128x128xf32, #tpu.memory_space<vmem>>, vector<128x128xf32>
    tpu.vector_store %arg5[%c0_6, %c0_7], %7 {strides = array<i32>} : memref<128x128xf32, #tpu.memory_space<vmem>>, vector<128x128xf32>,
    %c0_i32_8 = arith.constant 0 : i32
    %9 = arith.cmpi eq, %arg1, %c0_i32_8 : i32
    %10 = arith.extui %9 : i1 to i32
    %c0_i32_9 = arith.constant 0 : i32
    %11 = arith.cmpi ne, %10, %c0_i32_9 : i32
    scf.if %11 {
      %c0_10 = arith.constant 0 : index
      %c0_11 = arith.constant 0 : index
      %12 = vector.load %arg5[%c0_10, %c0_11] : memref<128x128xf32, #tpu.memory_space<vmem>>, vector<128x128xf32>
      %c0_12 = arith.constant 0 : index
      %c0_13 = arith.constant 0 : index
      %13 = vector.load %arg4[%c0_12, %c0_13] : memref<1x128xf32, #tpu.memory_space<vmem>>, vector<1x128xf32>
      %14 = vector.broadcast %13 : vector<1x128xf32> to vector<128x128xf32>
      %15 = arith.addf %12, %14 : vector<128x128xf32>
      %c0_14 = arith.constant 0 : index
      %c0_15 = arith.constant 0 : index
      %16 = vector.load %arg5[%c0_14, %c0_15] : memref<128x128xf32, #tpu.memory_space<vmem>>, vector<128x128xf32>
      tpu.vector_store %arg5[%c0_14, %c0_15], %15 {strides = array<i32>} : memref<128x128xf32, #tpu.memory_space<vmem>>, vector<128x128xf32>,
    } else {
    }
    return
  }
  func.func @transform_0(%arg0: i32, %arg1: i32) -> (i32, i32) {
    %c0_i32 = arith.constant 0 : i32
    return %arg0, %arg1 : i32, i32
  }
  func.func @transform_1(%arg0: i32, %arg1: i32) -> (i32, i32) {
    %c0_i32 = arith.constant 0 : i32
    %c0_i32_0 = arith.constant 0 : i32
    return %arg1, %c0_i32 : i32, i32
  }
  func.func @transform_2(%arg0: i32, %arg1: i32) -> (i32, i32) {
    %c0_i32 = arith.constant 0 : i32
    %c0_i32_0 = arith.constant 0 : i32
    %c0_i32_1 = arith.constant 0 : i32
    return %c0_i32, %c0_i32_0 : i32, i32
  }
  func.func @transform_3(%arg0: i32, %arg1: i32) -> (i32, i32) {
    %c0_i32 = arith.constant 0 : i32
    %c0_i32_0 = arith.constant 0 : i32
    return %arg0, %c0_i32 : i32, i32
  }
}

</mosaic_0001>

<bundles_post_ra>
// kernel: tpu_custom_call.1
= control target key start
LH: loop header
LB: loop body
LE: loop exit
PB: predicated region body
PF: predicated region fallthrough
CT: control target
= control target key end

     0   :  { %8 = vsyncpa [#allocation3], 0  ;;  %s623_s0 = inlined_call_operand.hbm [shape: bf16[128,128], index: 0, kind: input, shape index: {}]   ;;  %s624_s1 = inlined_call_operand.hbm [shape: bf16[128,128], index: 1, kind: input, shape index: {}]   ;;  %s625_s2 = inlined_call_operand.vmem [shape: f32[1,128], index: 2, kind: input, shape index: {}]   ;;  %s626_s3 = inlined_call_operand.hbm [shape: f32[128,128], index: 3, kind: output, shape index: {}]  }
   0x1   :  { %9 = vsyncpa [#allocation6], 0 }
   0x2   :  { %10 = vsyncpa [#allocation4], 0  ;;  %s584_s12 = smov [#allocation2]  }
   0x3   :  { %s16_s13 = sshll.u32 %s584_s12, 4  ;;  %s17_s13 = int_to_ptr.vmem [resolvable:$true] %s16_s13 }
   0x4   :  { %s526_s14 = scalar_lea.vmem %s17_s13, 1024  ;;  %p531_p1 = scmp.lt.s32.totalorder %s17_s13, %s17_s13 }
   0x5   :  { %p527_p0 = scmp.ne.s32.totalorder %s17_s13, %s526_s14  ;;  %p532_p2 = scmp.lt.s32.totalorder %s526_s14, %s526_s14 }
   0x7   :  { %p533_p3 = por %p532_p2, %p531_p1 }
   0x9   :  { %p534_p4 = pnand %p533_p3, %p527_p0 }
   0xb   :  { %537 = shalt.err (!%p534_p4)
}
   0xc   :  { %s585_s15 = smov 64   ;;  %s586_s16 = smov 4  }
   0xd   :  { %22 = dma.hbm_to_vmem [thread:$0]  %s623_s0, 1024, %s17_s13, [#allocation3], %s585_s15, %s585_s15, %s586_s16  }
   0xe   :  { %s587_s19 = smov [#allocation5]  }
   0xf   :  { %s28_s20 = sshll.u32 %s587_s19, 4  ;;  %s29_s20 = int_to_ptr.vmem [resolvable:$true] %s28_s20 }
  0x10   :  { %s546_s21 = scalar_lea.vmem %s29_s20, 1024  ;;  %p551_p6 = scmp.lt.s32.totalorder %s29_s20, %s29_s20 }
  0x11   :  { %p547_p5 = scmp.ne.s32.totalorder %s29_s20, %s546_s21  ;;  %p552_p7 = scmp.lt.s32.totalorder %s546_s21, %s546_s21 }
  0x13   :  { %p553_p8 = por %p552_p7, %p551_p6 }
  0x15   :  { %p554_p9 = pnand %p553_p8, %p547_p5 }
  0x17   :  { %557 = shalt.err (!%p554_p9)
}
  0x18   :  { %34 = dma.hbm_to_vmem [thread:$0]  %s624_s1, 1024, %s29_s20, [#allocation6], %s585_s15, %s585_s15, %s586_s16  }
  0x19   :  { %578 = dma.done.wait [#allocation3], 1024  }
  0x1a   :  { %579 = vsyncadd [#allocation3], 4294966272 }
  0x1b   :  { %580 = dma.done.wait [#allocation6], 1024  }
  0x1c   :  { %581 = vsyncadd [#allocation6], 4294966272  ;;  %v502_v0 = vld [vmem:[#allocation5 + $0x38] sm:$0xff]   ;;  %v503_v1 = vld [vmem:[#allocation5 + $0x30] sm:$0xff]  }
  0x1d   :  { %446 = vmatprep.subr.bf16.mxu0 %v502_v0  ;;  %478 = vmatprep.subr.bf16.mxu1 %v502_v0  ;;  %v504_v2 = vld [vmem:[#allocation5 + $0x28] sm:$0xff]   ;;  %v505_v3 = vld [vmem:[#allocation5 + $0x20] sm:$0xff]   ;;  %v506_v6 = vld [vmem:[#allocation5 + $0x18] sm:$0xff]  }
  0x1e   :  { %447 = vmatpush3.bf16.msra.mxu0 %v502_v0  ;;  %486 = vmatpush3.bf16.msra.mxu1 %v502_v0  ;;  %v510_v4 = vld [vmem:[#allocation2] sm:$0xff]   ;;  %v507_v7 = vld [vmem:[#allocation5 + $0x10] sm:$0xff]   ;;  %v508_v8 = vld [vmem:[#allocation5 + $0x8] sm:$0xff]  }
  0x1f   :  { %448 = vmatprep.subr.bf16.mxu0 %v503_v1  ;;  %479 = vmatprep.subr.bf16.mxu1 %v503_v1  ;;  %v511_v5 = vld [vmem:[#allocation2 + $0x20] sm:$0xff]   ;;  %v512_v10 = vld [vmem:[#allocation2 + $0x8] sm:$0xff]   ;;  %v514_v12 = vld [vmem:[#allocation2 + $0x10] sm:$0xff]  }
  0x20   :  { %462 = vmatprep.mubr.bf16.mxu0 %v510_v4  ;;  %470 = vmatprep.mubr.bf16.mxu1 %v511_v5  ;;  %v509_v9 = vld [vmem:[#allocation5] sm:$0xff]   ;;  %v513_v11 = vld [vmem:[#allocation2 + $0x28] sm:$0xff]   ;;  %v515_v13 = vld [vmem:[#allocation2 + $0x30] sm:$0xff]  }
  0x21   :  { %v516_v14 = vld [vmem:[#allocation2 + $0x18] sm:$0xff]   ;;  %v429_v17 = vld [vmem:[%s625_s2] ss:$0 sm:$0xff]  ;;  %s588_s2 = smov [#allocation7]  }
  0x22   :  { %449 = vmatpush3.bf16.msra.mxu0 %v503_v1  ;;  %487 = vmatpush3.bf16.msra.mxu1 %v503_v1  ;;  %v517_v15 = vld [vmem:[#allocation2 + $0x38] sm:$0xff]   ;;  %s400_s24 = sshll.u32 %s588_s2, 4  ;;  %s401_s24 = int_to_ptr.vmem [resolvable:$true] %s400_s24 }
  0x23   :  { %450 = vmatprep.subr.bf16.mxu0 %v504_v2  ;;  %480 = vmatprep.subr.bf16.mxu1 %v504_v2  ;;  %s558_s25 = scalar_lea.vmem %s401_s24, 2048  ;;  %p563_p11 = scmp.lt.s32.totalorder %s401_s24, %s401_s24 }
  0x24   :  { %p559_p10 = scmp.ne.s32.totalorder %s401_s24, %s558_s25  ;;  %p564_p12 = scmp.lt.s32.totalorder %s558_s25, %s558_s25 }
  0x26   :  { %451 = vmatpush3.bf16.msra.mxu0 %v504_v2  ;;  %488 = vmatpush3.bf16.msra.mxu1 %v504_v2  ;;  %p565_p13 = por %p564_p12, %p563_p11 }
  0x27   :  { %452 = vmatprep.subr.bf16.mxu0 %v505_v3  ;;  %481 = vmatprep.subr.bf16.mxu1 %v505_v3 }
  0x28   :  { %p566_p0 = pnand %p565_p13, %p559_p10 }
  0x2a   :  { %453 = vmatpush3.bf16.msra.mxu0 %v505_v3  ;;  %489 = vmatpush3.bf16.msra.mxu1 %v505_v3 }
  0x2b   :  { %454 = vmatprep.subr.bf16.mxu0 %v506_v6  ;;  %482 = vmatprep.subr.bf16.mxu1 %v506_v6 }
  0x2e   :  { %455 = vmatpush3.bf16.msra.mxu0 %v506_v6  ;;  %490 = vmatpush3.bf16.msra.mxu1 %v506_v6 }
  0x2f   :  { %456 = vmatprep.subr.bf16.mxu0 %v507_v7  ;;  %483 = vmatprep.subr.bf16.mxu1 %v507_v7 }
  0x32   :  { %457 = vmatpush3.bf16.msra.mxu0 %v507_v7  ;;  %491 = vmatpush3.bf16.msra.mxu1 %v507_v7 }
  0x33   :  { %458 = vmatprep.subr.bf16.mxu0 %v508_v8  ;;  %484 = vmatprep.subr.bf16.mxu1 %v508_v8 }
  0x36   :  { %459 = vmatpush3.bf16.msra.mxu0 %v508_v8  ;;  %492 = vmatpush3.bf16.msra.mxu1 %v508_v8 }
  0x37   :  { %460 = vmatprep.subr.bf16.mxu0 %v509_v9  ;;  %485 = vmatprep.subr.bf16.mxu1 %v509_v9 }
  0x3a   :  { %461 = vmatpush3.bf16.msra.mxu0 %v509_v9  ;;  %493 = vmatpush3.bf16.msra.mxu1 %v509_v9 }
  0x3d   :  { %463 = vmatmul.mubr.bf16.vlgmr.msra.gmra.mxu0 %v512_v10  ;;  %471 = vmatmul.mubr.bf16.vlgmr.msra.gmra.mxu1 %v513_v11 }
  0x3e   :  { %466 = vmatprep.mubr.bf16.mxu0 %v514_v12  ;;  %474 = vmatprep.mubr.bf16.mxu1 %v515_v13 }
  0x45   :  { %467 = vmatmul.mubr.bf16.gmra.mxu0 %v516_v14  ;;  %475 = vmatmul.mubr.bf16.gmra.mxu1 %v517_v15 }
  0xfd   :  { %v464_v16 = vpop.f32.mrf.mxu0  ;;  %v472_v18 = vpop.f32.mrf.mxu1 }
  0xfe   :  { %v365_v21 = vadd.f32 %v464_v16, %v429_v17  ;;  %v373_v22 = vadd.f32 %v472_v18, %v429_v17 }
  0xff   :  { %v242_v19 = vpop.f32.mrf.mxu0  ;;  %v274_v20 = vpop.f32.mrf.mxu1 }
 0x100   :  { %381 = vst [vmem:[#allocation7 + $0x10] sm:$0xff] %v365_v21  ;;  %389 = vst [vmem:[#allocation7 + $0x50] sm:$0xff] %v373_v22  ;;  %v363_v25 = vadd.f32 %v429_v17, %v242_v19  ;;  %v371_v26 = vadd.f32 %v429_v17, %v274_v20 }
 0x101   :  { %v465_v23 = vpop.f32.mrf.mxu0  ;;  %v473_v24 = vpop.f32.mrf.mxu1 }
 0x102   :  { %379 = vst [vmem:[#allocation7] sm:$0xff] %v363_v25  ;;  %387 = vst [vmem:[#allocation7 + $0x40] sm:$0xff] %v371_v26  ;;  %v366_v29 = vadd.f32 %v465_v23, %v429_v17  ;;  %v374_v30 = vadd.f32 %v473_v24, %v429_v17 }
 0x103   :  { %v245_v27 = vpop.f32.mrf.mxu0  ;;  %v277_v28 = vpop.f32.mrf.mxu1 }
 0x104   :  { %382 = vst [vmem:[#allocation7 + $0x18] sm:$0xff] %v366_v29  ;;  %390 = vst [vmem:[#allocation7 + $0x58] sm:$0xff] %v374_v30  ;;  %v364_v33 = vadd.f32 %v429_v17, %v245_v27  ;;  %v372_v34 = vadd.f32 %v429_v17, %v277_v28 }
 0x105   :  { %v468_v31 = vpop.f32.mrf.mxu0  ;;  %v476_v32 = vpop.f32.mrf.mxu1 }
 0x106   :  { %380 = vst [vmem:[#allocation7 + $0x8] sm:$0xff] %v364_v33  ;;  %388 = vst [vmem:[#allocation7 + $0x48] sm:$0xff] %v372_v34  ;;  %v369_v37 = vadd.f32 %v468_v31, %v429_v17  ;;  %v377_v38 = vadd.f32 %v476_v32, %v429_v17 }
 0x107   :  { %v258_v35 = vpop.f32.mrf.mxu0  ;;  %v290_v36 = vpop.f32.mrf.mxu1 }
 0x108   :  { %385 = vst [vmem:[#allocation7 + $0x30] sm:$0xff] %v369_v37  ;;  %393 = vst [vmem:[#allocation7 + $0x70] sm:$0xff] %v377_v38  ;;  %v367_v41 = vadd.f32 %v429_v17, %v258_v35  ;;  %v375_v42 = vadd.f32 %v429_v17, %v290_v36 }
 0x109   :  { %v469_v39 = vpop.f32.mrf.mxu0  ;;  %v477_v40 = vpop.f32.mrf.mxu1 }
 0x10a   :  { %383 = vst [vmem:[#allocation7 + $0x20] sm:$0xff] %v367_v41  ;;  %391 = vst [vmem:[#allocation7 + $0x60] sm:$0xff] %v375_v42  ;;  %v370_v45 = vadd.f32 %v469_v39, %v429_v17  ;;  %v378_v46 = vadd.f32 %v477_v40, %v429_v17 }
 0x10b   :  { %v261_v43 = vpop.f32.mrf.mxu0  ;;  %v293_v44 = vpop.f32.mrf.mxu1 }
 0x10c   :  { %386 = vst [vmem:[#allocation7 + $0x38] sm:$0xff] %v370_v45  ;;  %394 = vst [vmem:[#allocation7 + $0x78] sm:$0xff] %v378_v46  ;;  %v368_v47 = vadd.f32 %v429_v17, %v261_v43  ;;  %v376_v48 = vadd.f32 %v429_v17, %v293_v44 }
 0x10e   :  { %384 = vst [vmem:[#allocation7 + $0x28] sm:$0xff] %v368_v47  ;;  %392 = vst [vmem:[#allocation7 + $0x68] sm:$0xff] %v376_v48 }
 0x10f   :  { %569 = shalt.err (!%p566_p0)
}
 0x110   :  { %s589_s26 = smov 128   ;;  %s590_s27 = smov 8  }
 0x111   :  { %406 = dma.vmem_to_hbm [thread:$0]  %s401_s24, 2048, %s626_s3, [#allocation4], %s589_s26, %s589_s26, %s590_s27  }
 0x112   :  { %582 = dma.done.wait [#allocation4], 2048  }
 0x113   :  { %583 = vsyncadd [#allocation4], 4294965248 }
 0x114   :  { %410 = vsyncpa [#allocation3], 1 }
 0x115   :  { %411 = vsyncpa [#allocation6], 1 }
 0x116   :  { %412 = vsyncpa [#allocation4], 1 }

</bundles_post_ra>
